<compile_context>
chip_gen: v7x
topology: tpu7x:2x2x1
jax: 0.10.0
libtpu: 0.0.40
codegen_flags: <defaults>
</compile_context>

<pallas_src>
import jax
import jax.numpy as jnp
from jax.experimental import pallas as pl
from jax.experimental.pallas import tpu as pltpu


# ----------------------------------------------------------------------------
# helpers
# ----------------------------------------------------------------------------
def _round_up(n, m):
    return ((n + m - 1) // m) * m


def _pad_axis(a, axis, target):
    pad = target - a.shape[axis]
    if pad == 0:
        return a
    widths = [(0, 0)] * a.ndim
    widths[axis] = (0, pad)
    return jnp.pad(a, widths)


def _l2_normalize_cols(w):
    # torch F.normalize(w, dim=0), eps=1e-12 -- hoisted out of the kernel (one-shot).
    norm = jnp.sqrt(jnp.sum(w * w, axis=0, keepdims=True))
    return w / jnp.maximum(norm, 1e-12)


# ----------------------------------------------------------------------------
# Pallas kernels
# ----------------------------------------------------------------------------
def _dual_linear_kernel(x_ref, wn_ref, wf_ref, b_ref, cls_ref, fc_ref):
    """Fused: cls = x @ W_norm ; fc = x @ W_fc + b.  x/W in bf16, f32 accumulate."""
    x = x_ref[...]                                   # bf16 (tm, H)
    cls_ref[...] = jnp.dot(x, wn_ref[...], preferred_element_type=jnp.float32)
    fc_ref[...] = (
        jnp.dot(x, wf_ref[...], preferred_element_type=jnp.float32) + b_ref[...]
    )


def fused_classifier(x2d, wn_bf16, wf_bf16, fc_b_pad, num_classes, tm=128):
    """x2d: (N, H) f32. Returns (cls_logits, fc_logits), each (N, num_classes) f32."""
    N, H = x2d.shape
    C_pad = wn_bf16.shape[1]
    N_pad = _round_up(N, tm)
    x_p = _pad_axis(x2d, 0, N_pad).astype(jnp.bfloat16)   # cast once in wrapper

    cls_out, fc_out = pl.pallas_call(
        _dual_linear_kernel,
        out_shape=(
            jax.ShapeDtypeStruct((N_pad, C_pad), jnp.float32),
            jax.ShapeDtypeStruct((N_pad, C_pad), jnp.float32),
        ),
        grid=(N_pad // tm,),
        in_specs=[
            pl.BlockSpec((tm, H), lambda i: (i, 0)),
            pl.BlockSpec((H, C_pad), lambda i: (0, 0)),
            pl.BlockSpec((H, C_pad), lambda i: (0, 0)),
            pl.BlockSpec((1, C_pad), lambda i: (0, 0)),
        ],
        out_specs=(
            pl.BlockSpec((tm, C_pad), lambda i: (i, 0)),
            pl.BlockSpec((tm, C_pad), lambda i: (i, 0)),
        ),
        compiler_params=pltpu.CompilerParams(
            dimension_semantics=("parallel",),
            vmem_limit_bytes=32 * 1024 * 1024,
        ),
    )(x_p, wn_bf16, wf_bf16, fc_b_pad)

    return cls_out[:N, :num_classes], fc_out[:N, :num_classes]


def _mlm_head_kernel(x_ref, w1_ref, b1_ref, g_ref, be_ref, w2_ref, b2_ref,
                     o_ref, h_ref):
    """dense -> QuickGELU -> LayerNorm(fp32) computed once (v==0) into VMEM scratch,
    then one (L_pad, H) x (H, tv) GEMM block per grid step over the vocab dim."""

    @pl.when(pl.program_id(0) == 0)
    def _():
        h = (
            jnp.dot(x_ref[...], w1_ref[...], preferred_element_type=jnp.float32)
            + b1_ref[...]
        )
        h = h * jax.nn.sigmoid(1.702 * h)                       # QuickGELU (f32)
        mu = jnp.mean(h, axis=-1, keepdims=True)
        var = jnp.mean((h - mu) * (h - mu), axis=-1, keepdims=True)
        h = (h - mu) * jax.lax.rsqrt(var + 1e-5) * g_ref[...] + be_ref[...]
        h_ref[...] = h.astype(jnp.bfloat16)

    o_ref[...] = (
        jnp.dot(h_ref[...], w2_ref[...], preferred_element_type=jnp.float32)
        + b2_ref[...]
    )


def mlm_head(text, params, tv=512):
    """text: (L, H) f32 -> (L, mlm_vocab) f32, tiled over the vocab dimension."""
    L, H = text.shape
    V = params["mlm_w2"].shape[1]
    L_pad = _round_up(max(L, 16), 16)            # bf16-friendly sublane count
    V_pad = _round_up(V, tv)

    x_p = _pad_axis(text, 0, L_pad).astype(jnp.bfloat16)
    w1 = params["mlm_w1"].astype(jnp.bfloat16)
    w2 = _pad_axis(params["mlm_w2"], 1, V_pad).astype(jnp.bfloat16)
    b2 = _pad_axis(params["mlm_b2"], 1, V_pad)

    out = pl.pallas_call(
        _mlm_head_kernel,
        out_shape=jax.ShapeDtypeStruct((L_pad, V_pad), jnp.float32),
        grid=(V_pad // tv,),
        in_specs=[
            pl.BlockSpec((L_pad, H), lambda v: (0, 0)),
            pl.BlockSpec((H, H), lambda v: (0, 0)),
            pl.BlockSpec((1, H), lambda v: (0, 0)),
            pl.BlockSpec((1, H), lambda v: (0, 0)),
            pl.BlockSpec((1, H), lambda v: (0, 0)),
            pl.BlockSpec((H, tv), lambda v: (0, v)),
            pl.BlockSpec((1, tv), lambda v: (0, v)),
        ],
        out_specs=pl.BlockSpec((L_pad, tv), lambda v: (0, v)),
        scratch_shapes=[pltpu.VMEM((L_pad, H), jnp.bfloat16)],
        compiler_params=pltpu.CompilerParams(
            # scratch carries state across v -> must be "arbitrary"
            dimension_semantics=("arbitrary",),
            vmem_limit_bytes=32 * 1024 * 1024,
        ),
    )(x_p, w1, params["mlm_b1"], params["mlm_gamma"], params["mlm_beta"], w2, b2)

    return out[:L, :V]


# ----------------------------------------------------------------------------
# Parameter init (deterministic, in-script)
# ----------------------------------------------------------------------------
def init_params(key, hidden, num_classes, mlm_vocab):
    ks = jax.random.split(key, 8)
    scale = lambda fan_in: 1.0 / jnp.sqrt(jnp.float32(fan_in))
    return {
        # NormLinear classifier (shared with conv1d.fc): weight (in_dim, out_dim)
        "cls_w": jax.random.normal(ks[0], (hidden, num_classes), jnp.float32),
        # nn.Linear fc: stored as (in, out) + (1, out)
        "fc_w": jax.random.normal(ks[1], (hidden, num_classes), jnp.float32) * scale(hidden),
        "fc_b": jnp.zeros((1, num_classes), jnp.float32),
        # Embedding (num_classes, hidden)
        "embedding": jax.random.normal(ks[2], (num_classes, hidden), jnp.float32),
        # mlm_head
        "mlm_w1": jax.random.normal(ks[3], (hidden, hidden), jnp.float32) * scale(hidden),
        "mlm_b1": jnp.zeros((1, hidden), jnp.float32),
        "mlm_gamma": jnp.ones((1, hidden), jnp.float32),
        "mlm_beta": jnp.zeros((1, hidden), jnp.float32),
        "mlm_w2": jax.random.normal(ks[4], (hidden, mlm_vocab), jnp.float32) * scale(hidden),
        "mlm_b2": jnp.zeros((1, mlm_vocab), jnp.float32),
    }


# ----------------------------------------------------------------------------
# Forward (mirrors SLRModel.forward, non-5D input / batch!=2 training branch)
# ----------------------------------------------------------------------------
def slr_forward(params, x, len_x, label, label_lgt):
    T, B, H = x.shape
    num_classes = params["cls_w"].shape[1]
    framewise = x                                   # non-5D path: framewise = x
    # TODO(synk): TemporalConv (conv1d) not provided; visual_feat := framewise, lgt := len_x
    visual_feat = x
    lgt = len_x

    x2d = visual_feat.reshape(T * B, H)

    # --- weight prep (one-shot, hoisted out of kernels) -----------------------
    C_pad = _round_up(num_classes, 128)
    cls_w_n = _l2_normalize_cols(params["cls_w"])                 # NormLinear weight
    wn_bf16 = _pad_axis(cls_w_n, 1, C_pad).astype(jnp.bfloat16)
    wf_bf16 = _pad_axis(params["fc_w"], 1, C_pad).astype(jnp.bfloat16)
    fc_b_pad = _pad_axis(params["fc_b"], 1, C_pad)                # f32 bias

    # --- fused classifier: NormLinear (conv1d.fc == classifier) + fc ----------
    cls_flat, fc_flat = fused_classifier(x2d, wn_bf16, wf_bf16, fc_b_pad, num_classes)
    conv_logits = cls_flat.reshape(T, B, -1)
    cross_logits = fc_flat.reshape(T, B, -1)        # x_cross = x in the batch!=2 branch
    # TODO(synk): BiLSTM temporal_model not provided (identity placeholder), so
    # sequence_logits coincides with conv_logits; reuse instead of recomputing.
    sequence_logits = conv_logits

    # --- text branch (batch!=2 semantics): embedding lookup + mlm_head --------
    text = jnp.take(params["embedding"], label, axis=0)           # (L, H)
    mlm_out = mlm_head(text, params)                              # (L, mlm_vocab)
    # CrossEntropyLoss(mlm_out, label)
    logp = jax.nn.log_softmax(mlm_out, axis=-1)
    mlm_loss = -jnp.mean(jnp.take_along_axis(logp, label[:, None], axis=-1))

    return {
        "framewise_features": framewise,
        "visual_features": visual_feat,
        "feat_len": lgt,
        "conv_logits": conv_logits,
        "cross_logits": cross_logits,
        "sequence_logits": sequence_logits,
        "conv_sents": None,          # decoder (beam search) not translatable
        "recognized_sents": None,
        "mlm_loss": mlm_loss,
    }


# ----------------------------------------------------------------------------
if __name__ == "__main__":
    key = jax.random.PRNGKey(0)
    T, B, H = 8, 2, 32           # small test shapes (hidden=32 stands in for 1024)
    NUM_CLASSES = 40
    MLM_VOCAB = 1296
    L = 8                        # total label length

    k_p, k_x, k_l = jax.random.split(key, 3)
    params = init_params(k_p, H, NUM_CLASSES, MLM_VOCAB)

    x = jax.random.normal(k_x, (T, B, H), jnp.float32)
    len_x = jnp.array([T, T], jnp.int32)
    label = jax.random.randint(k_l, (L,), 0, NUM_CLASSES, jnp.int32)
    label_lgt = jnp.array([5, 3], jnp.int32)

    out = slr_forward(params, x, len_x, label, label_lgt)
    jax.block_until_ready(out["sequence_logits"])
    jax.block_until_ready(out["conv_logits"])
    jax.block_until_ready(out["cross_logits"])
    jax.block_until_ready(out["mlm_loss"])

    assert out["sequence_logits"].shape == (T, B, NUM_CLASSES)
    assert out["conv_logits"].shape == (T, B, NUM_CLASSES)
    assert out["cross_logits"].shape == (T, B, NUM_CLASSES)
    assert out["mlm_loss"].shape == ()
    print("KERNEL_OK")
</pallas_src>

<mosaic_0001>
module attributes {stable_mosaic.version = 11 : i64} {
  func.func @_dual_linear_kernel(%arg0: i32, %arg1: memref<128x32xbf16, #tpu.memory_space<vmem>>, %arg2: memref<32x128xbf16, #tpu.memory_space<vmem>>, %arg3: memref<32x128xbf16, #tpu.memory_space<vmem>>, %arg4: memref<1x128xf32, #tpu.memory_space<vmem>>, %arg5: memref<128x128xf32, #tpu.memory_space<vmem>>, %arg6: memref<128x128xf32, #tpu.memory_space<vmem>>) attributes {dimension_semantics = [#tpu.dimension_semantics<parallel>], iteration_bounds = array<i64: 1>, scalar_prefetch = 0 : i64, scratch_operands = 0 : i64, tpu.core_type = #tpu.core_type<tc>, window_params = [{transform_indices = @transform_0, window_bounds = array<i64: 128, 32>}, {pipeline_mode = #tpu.pipeline_mode<synchronous>, transform_indices = @transform_1, window_bounds = array<i64: 32, 128>}, {pipeline_mode = #tpu.pipeline_mode<synchronous>, transform_indices = @transform_2, window_bounds = array<i64: 32, 128>}, {pipeline_mode = #tpu.pipeline_mode<synchronous>, transform_indices = @transform_3, window_bounds = array<i64: 1, 128>}, {transform_indices = @transform_4, window_bounds = array<i64: 128, 128>}, {transform_indices = @transform_5, window_bounds = array<i64: 128, 128>}]} {
    %c0 = arith.constant 0 : index
    %c0_0 = arith.constant 0 : index
    %0 = vector.load %arg1[%c0, %c0_0] : memref<128x32xbf16, #tpu.memory_space<vmem>>, vector<128x32xbf16>
    %c0_1 = arith.constant 0 : index
    %c0_2 = arith.constant 0 : index
    %1 = vector.load %arg2[%c0_1, %c0_2] : memref<32x128xbf16, #tpu.memory_space<vmem>>, vector<32x128xbf16>
    %cst = arith.constant dense<0.000000e+00> : vector<128x128xf32>
    %2 = tpu.matmul %0, %1, %cst {dimension_numbers = #tpu.dot_dimension_numbers<[1], [0], [0], [1], [0, 0, 1, 1], [], []>} : vector<128x32xbf16>, vector<32x128xbf16>, vector<128x128xf32> -> vector<128x128xf32>
    %c0_3 = arith.constant 0 : index
    %c0_4 = arith.constant 0 : index
    %3 = vector.load %arg5[%c0_3, %c0_4] : memref<128x128xf32, #tpu.memory_space<vmem>>, vector<128x128xf32>
    tpu.vector_store %arg5[%c0_3, %c0_4], %2 {strides = array<i32>} : memref<128x128xf32, #tpu.memory_space<vmem>>, vector<128x128xf32>,
    %c0_5 = arith.constant 0 : index
    %c0_6 = arith.constant 0 : index
    %4 = vector.load %arg3[%c0_5, %c0_6] : memref<32x128xbf16, #tpu.memory_space<vmem>>, vector<32x128xbf16>
    %cst_7 = arith.constant dense<0.000000e+00> : vector<128x128xf32>
    %5 = tpu.matmul %0, %4, %cst_7 {dimension_numbers = #tpu.dot_dimension_numbers<[1], [0], [0], [1], [0, 0, 1, 1], [], []>} : vector<128x32xbf16>, vector<32x128xbf16>, vector<128x128xf32> -> vector<128x128xf32>
    %c0_8 = arith.constant 0 : index
    %c0_9 = arith.constant 0 : index
    %6 = vector.load %arg4[%c0_8, %c0_9] : memref<1x128xf32, #tpu.memory_space<vmem>>, vector<1x128xf32>
    %7 = vector.broadcast %6 : vector<1x128xf32> to vector<128x128xf32>
    %8 = arith.addf %5, %7 : vector<128x128xf32>
    %c0_10 = arith.constant 0 : index
    %c0_11 = arith.constant 0 : index
    %9 = vector.load %arg6[%c0_10, %c0_11] : memref<128x128xf32, #tpu.memory_space<vmem>>, vector<128x128xf32>
    tpu.vector_store %arg6[%c0_10, %c0_11], %8 {strides = array<i32>} : memref<128x128xf32, #tpu.memory_space<vmem>>, vector<128x128xf32>,
    return
  }
  func.func @transform_0(%arg0: i32) -> (i32, i32) {
    %c0_i32 = arith.constant 0 : i32
    %c0_i32_0 = arith.constant 0 : i32
    return %arg0, %c0_i32 : i32, i32
  }
  func.func @transform_1(%arg0: i32) -> (i32, i32) {
    %c0_i32 = arith.constant 0 : i32
    %c0_i32_0 = arith.constant 0 : i32
    %c0_i32_1 = arith.constant 0 : i32
    return %c0_i32, %c0_i32_0 : i32, i32
  }
  func.func @transform_2(%arg0: i32) -> (i32, i32) {
    %c0_i32 = arith.constant 0 : i32
    %c0_i32_0 = arith.constant 0 : i32
    %c0_i32_1 = arith.constant 0 : i32
    return %c0_i32, %c0_i32_0 : i32, i32
  }
  func.func @transform_3(%arg0: i32) -> (i32, i32) {
    %c0_i32 = arith.constant 0 : i32
    %c0_i32_0 = arith.constant 0 : i32
    %c0_i32_1 = arith.constant 0 : i32
    return %c0_i32, %c0_i32_0 : i32, i32
  }
  func.func @transform_4(%arg0: i32) -> (i32, i32) {
    %c0_i32 = arith.constant 0 : i32
    %c0_i32_0 = arith.constant 0 : i32
    return %arg0, %c0_i32 : i32, i32
  }
  func.func @transform_5(%arg0: i32) -> (i32, i32) {
    %c0_i32 = arith.constant 0 : i32
    %c0_i32_0 = arith.constant 0 : i32
    return %arg0, %c0_i32 : i32, i32
  }
}

</mosaic_0001>

<bundles_post_ra>
// kernel: tpu_custom_call.1
= control target key start
LH: loop header
LB: loop body
LE: loop exit
PB: predicated region body
PF: predicated region fallthrough
CT: control target
= control target key end

     0   :  { %11 = vsyncpa [#allocation3], 0  ;;  %vm94_vm0 = vcmask 261120   ;;  %s698_s0 = inlined_call_operand.vmem [shape: bf16[128,32], index: 0, kind: input, shape index: {}]   ;;  %s699_s1 = inlined_call_operand.vmem [shape: bf16[32,128], index: 1, kind: input, shape index: {}]   ;;  %s700_s2 = inlined_call_operand.vmem [shape: bf16[32,128], index: 2, kind: input, shape index: {}]   ;;  %s701_s3 = inlined_call_operand.vmem [shape: f32[1,128], index: 3, kind: input, shape index: {}]   ;;  %s702_s4 = inlined_call_operand.hbm [shape: f32[128,128], index: 4, kind: output, shape index: {0}]   ;;  %s703_s5 = inlined_call_operand.hbm [shape: f32[128,128], index: 5, kind: output, shape index: {1}]  }
   0x1   :  { %v493_v0 = vld [vmem:[%s699_s1] sm:$0xff]   ;;  %v495_v2 = vld [vmem:[%s699_s1 + $0x8] sm:$0xff]   ;;  %v499_v6 = vld [vmem:[%s698_s0 + $0x10] sm:$0xff]  }
   0x2   :  { %v494_v1 = vld [vmem:[%s700_s2] sm:$0xff]   ;;  %449 = vmatprep.subr.bf16.mxu0 %v493_v0  ;;  %v496_v3 = vld [vmem:[%s700_s2 + $0x8] sm:$0xff]  }
   0x3   :  { %469 = vmatprep.subr.bf16.mxu1 %v494_v1  ;;  %450 = vmatpush3.bf16.msra.mxu0 %v493_v0  ;;  %v497_v4 = vld [vmem:[%s698_s0] sm:$0xff]   ;;  %v498_v5 = vld [vmem:[%s698_s0 + $0x8] sm:$0xff]  }
   0x4   :  { %470 = vmatpush3.bf16.msra.mxu1 %v494_v1  ;;  %451 = vmatprep.subr.bf16.mxu0 %v495_v2 }
   0x5   :  { %471 = vmatprep.subr.bf16.mxu1 %v496_v3  ;;  %453 = vmatprep.mubr.msk.bf16.mxu0 %vm94_vm0, %v497_v4 }
   0x6   :  { %473 = vmatprep.mubr.msk.bf16.mxu1 %vm94_vm0, %v497_v4 }
   0x7   :  { %452 = vmatpush3.bf16.msra.mxu0 %v495_v2 }
   0x8   :  { %472 = vmatpush3.bf16.msra.mxu1 %v496_v3 }
   0xa   :  { %454 = vmatmul.mubr.msk.bf16.vlgmr.msra.gmra.mrb[0].mxu0 %vm94_vm0, %v498_v5 }
   0xb   :  { %474 = vmatmul.mubr.msk.bf16.vlgmr.msra.gmra.mrb[0].mxu1 %vm94_vm0, %v498_v5  ;;  %457 = vmatprep.mubr.msk.bf16.mxu0 %vm94_vm0, %v499_v6 }
   0xc   :  { %477 = vmatprep.mubr.msk.bf16.mxu1 %vm94_vm0, %v499_v6 }
   0xd   :  { %12 = vsyncpa [#allocation5], 0  ;;  %v500_v7 = vld [vmem:[%s698_s0 + $0x18] sm:$0xff]   ;;  %v501_v8 = vld [vmem:[%s698_s0 + $0x20] sm:$0xff]   ;;  %s554_s17 = smov [#allocation4]  }
   0xe   :  { %v502_v9 = vld [vmem:[%s698_s0 + $0x28] sm:$0xff]   ;;  %v503_v10 = vld [vmem:[%s698_s0 + $0x30] sm:$0xff]   ;;  %v504_v11 = vld [vmem:[%s698_s0 + $0x38] sm:$0xff]   ;;  %s553_s0 = smov [#allocation2]   ;;  %s385_s18 = sshll.u32 %s554_s17, 4  ;;  %s661_s18 = int_to_ptr.vmem [resolvable:$true] %s385_s18 }
   0xf   :  { %v642_v12 = vld [vmem:[%s701_s3] ss:$0 sm:$0xff]  ;;  %s373_s3 = sshll.u32 %s553_s0, 4  ;;  %s656_s3 = int_to_ptr.vmem [resolvable:$true] %s373_s3 }
  0x10   :  { %s505_s19 = scalar_lea.vmem %s656_s3, 2048  ;;  %p510_p1 = scmp.lt.s32.totalorder %s656_s3, %s656_s3 }
  0x11   :  { %p506_p0 = scmp.ne.s32.totalorder %s656_s3, %s505_s19  ;;  %p511_p2 = scmp.lt.s32.totalorder %s505_s19, %s505_s19 }
  0x12   :  { %458 = vmatmul.mubr.msk.bf16.gmra.mrb[4].mxu0 %vm94_vm0, %v500_v7 }
  0x13   :  { %478 = vmatmul.mubr.msk.bf16.gmra.mrb[4].mxu1 %vm94_vm0, %v500_v7  ;;  %461 = vmatprep.mubr.msk.bf16.mxu0 %vm94_vm0, %v501_v8  ;;  %p512_p3 = por %p511_p2, %p510_p1 }
  0x14   :  { %481 = vmatprep.mubr.msk.bf16.mxu1 %vm94_vm0, %v501_v8 }
  0x15   :  { %p513_p4 = pnand %p512_p3, %p506_p0 }
  0x1a   :  { %462 = vmatmul.mubr.msk.bf16.gmra.mrb[8].mxu0 %vm94_vm0, %v502_v9 }
  0x1b   :  { %482 = vmatmul.mubr.msk.bf16.gmra.mrb[8].mxu1 %vm94_vm0, %v502_v9  ;;  %465 = vmatprep.mubr.msk.bf16.mxu0 %vm94_vm0, %v503_v10 }
  0x1c   :  { %485 = vmatprep.mubr.msk.bf16.mxu1 %vm94_vm0, %v503_v10 }
  0x22   :  { %466 = vmatmul.mubr.msk.bf16.gmra.mrb[12].mxu0 %vm94_vm0, %v504_v11 }
  0x23   :  { %486 = vmatmul.mubr.msk.bf16.gmra.mrb[12].mxu1 %vm94_vm0, %v504_v11 }
  0xdd   :  { %v455_v13 = vpop.f32.mrb[0].mxu0 }
  0xde   :  { %218 = vst [vmem:[#allocation2 + $0x10] sm:$0xff] %v455_v13  ;;  %v475_v14 = vpop.f32.mrb[0].mxu1  ;;  %v153_v15 = vpop.f32.mrb[1].mxu0 }
  0xdf   :  { %v298_v16 = vadd.f32 %v475_v14, %v642_v12  ;;  %216 = vst [vmem:[#allocation2] sm:$0xff] %v153_v15  ;;  %v289_v17 = vpop.f32.mrb[1].mxu1  ;;  %v456_v18 = vpop.f32.mrb[2].mxu0 }
  0xe0   :  { %v290_v19 = vadd.f32 %v642_v12, %v289_v17  ;;  %219 = vst [vmem:[#allocation2 + $0x18] sm:$0xff] %v456_v18  ;;  %v476_v20 = vpop.f32.mrb[2].mxu1  ;;  %v156_v21 = vpop.f32.mrb[3].mxu0 }
  0xe1   :  { %354 = vst [vmem:[#allocation4 + $0x10] sm:$0xff] %v298_v16  ;;  %v301_v22 = vadd.f32 %v476_v20, %v642_v12  ;;  %217 = vst [vmem:[#allocation2 + $0x8] sm:$0xff] %v156_v21  ;;  %v292_v23 = vpop.f32.mrb[3].mxu1 }
  0xe2   :  { %352 = vst [vmem:[#allocation4] sm:$0xff] %v290_v19  ;;  %v293_v24 = vadd.f32 %v642_v12, %v292_v23 }
  0xe3   :  { %355 = vst [vmem:[#allocation4 + $0x18] sm:$0xff] %v301_v22 }
  0xe4   :  { %353 = vst [vmem:[#allocation4 + $0x8] sm:$0xff] %v293_v24 }
  0xe5   :  { %v459_v25 = vpop.f32.mrb[4].mxu0 }
  0xe6   :  { %222 = vst [vmem:[#allocation2 + $0x30] sm:$0xff] %v459_v25  ;;  %v479_v26 = vpop.f32.mrb[4].mxu1  ;;  %v169_v27 = vpop.f32.mrb[5].mxu0 }
  0xe7   :  { %v314_v28 = vadd.f32 %v479_v26, %v642_v12  ;;  %220 = vst [vmem:[#allocation2 + $0x20] sm:$0xff] %v169_v27  ;;  %v305_v29 = vpop.f32.mrb[5].mxu1  ;;  %v460_v30 = vpop.f32.mrb[6].mxu0 }
  0xe8   :  { %v306_v31 = vadd.f32 %v642_v12, %v305_v29  ;;  %223 = vst [vmem:[#allocation2 + $0x38] sm:$0xff] %v460_v30  ;;  %v480_v32 = vpop.f32.mrb[6].mxu1  ;;  %v172_v33 = vpop.f32.mrb[7].mxu0 }
  0xe9   :  { %358 = vst [vmem:[#allocation4 + $0x30] sm:$0xff] %v314_v28  ;;  %v317_v34 = vadd.f32 %v480_v32, %v642_v12  ;;  %221 = vst [vmem:[#allocation2 + $0x28] sm:$0xff] %v172_v33  ;;  %v308_v35 = vpop.f32.mrb[7].mxu1 }
  0xea   :  { %356 = vst [vmem:[#allocation4 + $0x20] sm:$0xff] %v306_v31  ;;  %v309_v36 = vadd.f32 %v642_v12, %v308_v35 }
  0xeb   :  { %359 = vst [vmem:[#allocation4 + $0x38] sm:$0xff] %v317_v34 }
  0xec   :  { %357 = vst [vmem:[#allocation4 + $0x28] sm:$0xff] %v309_v36 }
  0xed   :  { %v463_v37 = vpop.f32.mrb[8].mxu0 }
  0xee   :  { %226 = vst [vmem:[#allocation2 + $0x50] sm:$0xff] %v463_v37  ;;  %v483_v38 = vpop.f32.mrb[8].mxu1  ;;  %v185_v39 = vpop.f32.mrb[9].mxu0 }
  0xef   :  { %v330_v40 = vadd.f32 %v483_v38, %v642_v12  ;;  %224 = vst [vmem:[#allocation2 + $0x40] sm:$0xff] %v185_v39  ;;  %v321_v41 = vpop.f32.mrb[9].mxu1  ;;  %v464_v42 = vpop.f32.mrb[10].mxu0 }
  0xf0   :  { %v322_v43 = vadd.f32 %v642_v12, %v321_v41  ;;  %227 = vst [vmem:[#allocation2 + $0x58] sm:$0xff] %v464_v42  ;;  %v484_v44 = vpop.f32.mrb[10].mxu1  ;;  %v188_v45 = vpop.f32.mrb[11].mxu0 }
  0xf1   :  { %362 = vst [vmem:[#allocation4 + $0x50] sm:$0xff] %v330_v40  ;;  %v333_v46 = vadd.f32 %v484_v44, %v642_v12  ;;  %225 = vst [vmem:[#allocation2 + $0x48] sm:$0xff] %v188_v45  ;;  %v324_v47 = vpop.f32.mrb[11].mxu1 }
  0xf2   :  { %360 = vst [vmem:[#allocation4 + $0x40] sm:$0xff] %v322_v43  ;;  %v325_v48 = vadd.f32 %v642_v12, %v324_v47 }
  0xf3   :  { %363 = vst [vmem:[#allocation4 + $0x58] sm:$0xff] %v333_v46 }
  0xf4   :  { %361 = vst [vmem:[#allocation4 + $0x48] sm:$0xff] %v325_v48 }
  0xf5   :  { %v467_v49 = vpop.f32.mrb[12].mxu0 }
  0xf6   :  { %230 = vst [vmem:[#allocation2 + $0x70] sm:$0xff] %v467_v49  ;;  %v487_v50 = vpop.f32.mrb[12].mxu1  ;;  %v201_v51 = vpop.f32.mrb[13].mxu0 }
  0xf7   :  { %v346_v52 = vadd.f32 %v487_v50, %v642_v12  ;;  %228 = vst [vmem:[#allocation2 + $0x60] sm:$0xff] %v201_v51  ;;  %v337_v53 = vpop.f32.mrb[13].mxu1  ;;  %v468_v54 = vpop.f32.mrb[14].mxu0 }
  0xf8   :  { %v338_v55 = vadd.f32 %v642_v12, %v337_v53  ;;  %231 = vst [vmem:[#allocation2 + $0x78] sm:$0xff] %v468_v54  ;;  %v488_v56 = vpop.f32.mrb[14].mxu1  ;;  %v204_v57 = vpop.f32.mrb[15].mxu0 }
  0xf9   :  { %366 = vst [vmem:[#allocation4 + $0x70] sm:$0xff] %v346_v52  ;;  %v349_v58 = vadd.f32 %v488_v56, %v642_v12  ;;  %229 = vst [vmem:[#allocation2 + $0x68] sm:$0xff] %v204_v57  ;;  %v340_v59 = vpop.f32.mrb[15].mxu1 }
  0xfa   :  { %364 = vst [vmem:[#allocation4 + $0x60] sm:$0xff] %v338_v55  ;;  %v341_v60 = vadd.f32 %v642_v12, %v340_v59 }
  0xfb   :  { %516 = shalt.err (!%p513_p4)
}
  0xfc   :  { %s517_s22 = scalar_lea.hbm %s702_s4, 2048 }
  0xfd   :  { %p518_p5 = scmp.ne.s32.totalorder %s702_s4, %s517_s22  ;;  %p521_p6 = scmp.lt.u32.totalorder %s517_s22, %s702_s4 }
  0xff   :  { %p523_p7 = pnand %p521_p6, %p518_p5 }
 0x101   :  { %526 = shalt.err (!%p523_p7)
}
 0x102   :  { %s555_s27 = smov 128   ;;  %s556_s28 = smov 8   ;;  %367 = vst [vmem:[#allocation4 + $0x78] sm:$0xff] %v349_v58  ;;  %365 = vst [vmem:[#allocation4 + $0x68] sm:$0xff] %v341_v60 }
 0x103   :  { %379 = dma.vmem_to_hbm [thread:$0]  %s656_s3, 2048, %s702_s4, [#allocation3], %s555_s27, %s555_s27, %s556_s28  }
 0x104   :  { %s527_s30 = scalar_lea.vmem %s661_s18, 2048  ;;  %p532_p9 = scmp.lt.s32.totalorder %s661_s18, %s661_s18 }
 0x105   :  { %p528_p8 = scmp.ne.s32.totalorder %s661_s18, %s527_s30  ;;  %p533_p10 = scmp.lt.s32.totalorder %s527_s30, %s527_s30 }
 0x107   :  { %p534_p11 = por %p533_p10, %p532_p9 }
 0x109   :  { %p535_p12 = pnand %p534_p11, %p528_p8 }
 0x10b   :  { %538 = shalt.err (!%p535_p12)
}
 0x10c   :  { %s539_s7 = scalar_lea.hbm %s703_s5, 2048 }
 0x10d   :  { %p540_p13 = scmp.ne.s32.totalorder %s703_s5, %s539_s7  ;;  %p543_p0 = scmp.lt.u32.totalorder %s539_s7, %s703_s5 }
 0x10f   :  { %p545_p1 = pnand %p543_p0, %p540_p13 }
 0x111   :  { %548 = shalt.err (!%p545_p1)
}
 0x112   :  { %391 = dma.vmem_to_hbm [thread:$0]  %s661_s18, 2048, %s703_s5, [#allocation5], %s555_s27, %s555_s27, %s556_s28  }
 0x113   :  { %549 = dma.done.wait [#allocation3], 2048  }
 0x114   :  { %550 = vsyncadd [#allocation3], 4294965248 }
 0x115   :  { %551 = dma.done.wait [#allocation5], 2048  }
 0x116   :  { %552 = vsyncadd [#allocation5], 4294965248 }
 0x117   :  { %398 = vsyncpa [#allocation3], 1 }
 0x118   :  { %399 = vsyncpa [#allocation5], 1 }

</bundles_post_ra>
